<compile_context>
chip_gen: v7x
topology: tpu7x:2x2x1
jax: 0.10.0
libtpu: 0.0.40
codegen_flags: <defaults>
</compile_context>

<pallas_src>
import functools

import jax
import jax.numpy as jnp
from jax.experimental import pallas as pl
from jax.experimental.pallas import tpu as pltpu


def _round_up(x: int, m: int) -> int:
    return ((x + m - 1) // m) * m


# ---------------------------------------------------------------------------
# Kernels
# ---------------------------------------------------------------------------
def _ffn_kernel(x_ref, w1_ref, b1_ref, w2_ref, b2_ref, o_ref, acc_ref):
    # x:(tm,d_model) w1:(d_model,dff_t) b1:(1,dff_t) w2:(dff_t,d_model) b2:(1,d_model)
    k = pl.program_id(1)

    @pl.when(k == 0)
    def _init():
        acc_ref[...] = jnp.zeros_like(acc_ref)

    h = jnp.dot(x_ref[...], w1_ref[...], preferred_element_type=jnp.float32)
    h = h + b1_ref[...].astype(jnp.float32)
    # Eval mode: dropout is identity.
    acc_ref[...] += jnp.dot(h.astype(w2_ref.dtype), w2_ref[...],
                            preferred_element_type=jnp.float32)

    @pl.when(k == pl.num_programs(1) - 1)
    def _finalize():
        o_ref[...] = (acc_ref[...]
                      + b2_ref[...].astype(jnp.float32)).astype(o_ref.dtype)


def _ffn_dropout_kernel(seed_ref, x_ref, w1_ref, b1_ref, w2_ref, b2_ref,
                        o_ref, acc_ref, *, rate):
    # Training mode: inverted dropout on the hidden activation.
    k = pl.program_id(1)
    n_k = pl.num_programs(1)

    @pl.when(k == 0)
    def _init():
        acc_ref[...] = jnp.zeros_like(acc_ref)

    h = jnp.dot(x_ref[...], w1_ref[...], preferred_element_type=jnp.float32)
    h = h + b1_ref[...].astype(jnp.float32)

    # Per-tile seeding (pattern depends on tiling; see module docstring).
    pltpu.prng_seed(seed_ref[0] + pl.program_id(0) * n_k + k)
    bits = pltpu.prng_random_bits(h.shape)
    if bits.dtype != jnp.dtype(jnp.uint32):      # only bitcast if actually needed
        bits = pltpu.bitcast(bits, jnp.uint32)
    threshold = jnp.uint32(min(int(rate * (1 << 32)), (1 << 32) - 1))
    # Mask-only select on the big (tm, dff_tile) tensor; the 1/(1-p) scale is
    # folded into the small (tm, d_model) output below.
    h = jnp.where(bits >= threshold, h, jnp.zeros_like(h))

    acc_ref[...] += jnp.dot(h.astype(w2_ref.dtype), w2_ref[...],
                            preferred_element_type=jnp.float32)

    @pl.when(k == n_k - 1)
    def _finalize():
        scale = jnp.float32(1.0 / (1.0 - rate))
        o_ref[...] = (acc_ref[...] * scale
                      + b2_ref[...].astype(jnp.float32)).astype(o_ref.dtype)


# ---------------------------------------------------------------------------
# Hardware / tiling plan
# ---------------------------------------------------------------------------
_HEADROOM = 1.15


def _tpu_info():
    """Returns (vmem_capacity_bytes, mxu_align, tensorcores_per_chip)."""
    vmem_cap = None
    try:
        vmem_cap = int(pltpu.get_tpu_info().vmem_capacity_bytes)
    except Exception:
        pass
    kind = ""
    try:
        kind = jax.devices()[0].device_kind.lower()
    except Exception:
        pass
    if "v5 lite" in kind or "v5e" in kind or "v5lite" in kind:
        mxu_align, n_tc, vmem_default = 128, 1, 128 * 1024 * 1024
    elif "v7" in kind:
        mxu_align, n_tc, vmem_default = 256, 2, 64 * 1024 * 1024
    else:  # v6e / v5p / v4 / unknown
        mxu_align, n_tc, vmem_default = 256, 1, 128 * 1024 * 1024
    if vmem_cap is None:
        vmem_cap = vmem_default
    return vmem_cap, mxu_align, n_tc


def _vmem_need_bytes(tm, d_model, dff_tile, k_steps, x_isz, w_isz, o_isz):
    """Estimated per-step VMEM footprint in bytes."""
    wbuf = 1 if k_steps == 1 else 2          # resident weights single-buffered
    n = 0
    n += 2 * tm * d_model * x_isz            # x tile, double-buffered
    n += 2 * tm * d_model * o_isz            # out tile, double-buffered
    n += wbuf * d_model * dff_tile * w_isz   # W1 tile
    n += wbuf * 8 * dff_tile * w_isz         # b1 tile (sublane padded)
    n += wbuf * dff_tile * d_model * w_isz   # W2 tile
    n += 8 * d_model * w_isz                 # b2 (resident, single-buffered)
    n += tm * d_model * 4                    # f32 accumulator scratch
    n += 2 * tm * dff_tile * 4               # f32 hidden temporaries
    return n


def _pick_row_tile(m, tile_m, min_sub, mxu_align):
    mp_min = _round_up(m, min_sub)
    if mp_min <= 2 * min_sub:
        # tiny: one or two minimum-size tiles
        return min_sub if mp_min == 2 * min_sub else mp_min
    if mp_min < 2 * mxu_align:
        # small: exactly two steps so both TensorCores (v7x) get work
        return _round_up(-(-m // 2), min_sub)
    # large: MXU-aligned tile, capped by tile_m
    tm = min(int(tile_m), mp_min)
    return max(mxu_align, (tm // mxu_align) * mxu_align)


def _plan_tiles(m, d_model, dff, tile_m, x_isz, w_isz, o_isz, budget,
                mxu_align, min_sub, max_dff_tile=None):
    """Pick (tm, dff_tile, k_steps, vmem_limit_hint) that fits `budget`."""

    def need(tm_, dt_, k_):
        return _vmem_need_bytes(tm_, d_model, dt_, k_, x_isz, w_isz, o_isz)

    resident_ok = (max_dff_tile is None) or (max_dff_tile >= dff)
    tm = _pick_row_tile(m, tile_m, min_sub, mxu_align)
    while True:
        if resident_ok and need(tm, dff, 1) * _HEADROOM <= budget:
            return tm, dff, 1, int(need(tm, dff, 1) * _HEADROOM)
        # dff tiling: largest MXU-aligned tile that fits (128 on v5e, 256 else)
        start = (dff // mxu_align) * mxu_align
        if max_dff_tile is not None:
            start = min(start, (max_dff_tile // mxu_align) * mxu_align)
        cand = start
        while cand >= mxu_align:
            k = -(-dff // cand)
            if k >= 2 and need(tm, cand, k) * _HEADROOM <= budget:
                return tm, cand, k, int(need(tm, cand, k) * _HEADROOM)
            cand -= mxu_align
        # Shrink the row tile and retry.
        if tm > min_sub:
            new_tm = max(min_sub, ((tm // 2) // min_sub) * min_sub)
            if new_tm >= mxu_align:
                new_tm = (new_tm // mxu_align) * mxu_align
            if new_tm < tm:
                tm = new_tm
                continue
        # Last resort: smallest sensible tiles (compile may spill).
        dff_tile = mxu_align if dff >= mxu_align else dff
        k = -(-dff // dff_tile)
        return tm, dff_tile, k, int(need(tm, dff_tile, k) * _HEADROOM)


def _block_spec(shape, index_map, buffers=None):
    """BlockSpec with optional pipeline buffer count (graceful fallback)."""
    if buffers is not None:
        try:
            return pl.BlockSpec(shape, index_map,
                                pipeline_mode=pl.Buffered(buffers))
        except TypeError:
            pass
    return pl.BlockSpec(shape, index_map)


def _mk_specs(tm, d_model, dff_tile, k_steps, with_seed):
    # Resident weights (k_steps == 1): single-buffer; streamed weights: default
    # double buffering so the W1/W2 DMAs hide behind the MXU.
    wbuf = 1 if k_steps == 1 else None
    if with_seed:
        x_map = lambda i, k, s: (i, 0)
        w1_map = lambda i, k, s: (0, k)
        b1_map = lambda i, k, s: (0, k)
        w2_map = lambda i, k, s: (k, 0)
        b2_map = lambda i, k, s: (0, 0)
        o_map = lambda i, k, s: (i, 0)
    else:
        x_map = lambda i, k: (i, 0)
        w1_map = lambda i, k: (0, k)
        b1_map = lambda i, k: (0, k)
        w2_map = lambda i, k: (k, 0)
        b2_map = lambda i, k: (0, 0)
        o_map = lambda i, k: (i, 0)
    in_specs = [
        _block_spec((tm, d_model), x_map),
        _block_spec((d_model, dff_tile), w1_map, wbuf),
        _block_spec((1, dff_tile), b1_map, wbuf),
        _block_spec((dff_tile, d_model), w2_map, wbuf),
        _block_spec((1, d_model), b2_map, 1),
    ]
    out_spec = _block_spec((tm, d_model), o_map)
    return in_specs, out_spec


# ---------------------------------------------------------------------------
# Wrapper
# ---------------------------------------------------------------------------
def feed_forward_block(x, w1, b1, w2, b2, *, dropout_rate=0.0, training=False,
                       seed=0, tile_m=512, compute_dtype=None,
                       max_dff_tile=None):
    """x: (..., d_model); w1: (d_model, dff); b1: (dff,); w2: (dff, d_model); b2: (d_model,).

    compute_dtype: optional dtype (e.g. jnp.bfloat16) to cast operands to at the
    kernel boundary (f32 accumulation is kept); None keeps x.dtype.
    max_dff_tile: optional cap on the dff tile (mainly for testing the
    accumulating dff-tiled path).
    """
    orig_shape = x.shape
    out_dtype = x.dtype
    d_model = orig_shape[-1]
    dff = w1.shape[1]
    assert w1.shape == (d_model, dff)
    assert b1.shape == (dff,)
    assert w2.shape == (dff, d_model)
    assert b2.shape == (d_model,)
    assert 0.0 <= float(dropout_rate) < 1.0

    cd = jnp.dtype(compute_dtype) if compute_dtype is not None else jnp.dtype(x.dtype)
    x2 = x.reshape(-1, d_model).astype(cd)
    w1c = w1.astype(cd)
    w2c = w2.astype(cd)
    m = x2.shape[0]

    x_isz = cd.itemsize
    w_isz = cd.itemsize
    o_isz = jnp.dtype(out_dtype).itemsize
    min_sub = {4: 8, 2: 16, 1: 32}.get(x_isz, 8)   # sublane minimum per dtype

    vmem_cap, mxu_align, n_tc = _tpu_info()
    budget = int(0.85 * vmem_cap)   # ≈54 MiB on v7x, ≈108 MiB on v5e/v6e

    tm, dff_tile, k_steps, need_bytes = _plan_tiles(
        m, d_model, dff, tile_m, x_isz, w_isz, o_isz, budget, mxu_align,
        min_sub, max_dff_tile=max_dff_tile)

    # Pad rows to a whole number of tiles; keep the row-step count a multiple
    # of the TensorCore count (v7x) so both cores get balanced work.
    mp = _round_up(m, tm)
    m_steps = mp // tm
    if n_tc >= 2 and m_steps > 1 and (m_steps % n_tc):
        m_steps = _round_up(m_steps, n_tc)
        mp = m_steps * tm
    if mp != m:
        x2 = jnp.pad(x2, ((0, mp - m), (0, 0)))

    # Pad dff so it divides evenly into dff_tile (zero pads contribute nothing:
    # zero W1 columns + zero b1 give zero hidden, zero W2 rows give zero output).
    dff_p = dff_tile * k_steps
    if dff_p != dff:
        w1c = jnp.pad(w1c, ((0, 0), (0, dff_p - dff)))
        w2c = jnp.pad(w2c, ((0, dff_p - dff), (0, 0)))
        b1p = jnp.pad(b1, ((0, dff_p - dff),))
    else:
        b1p = b1
    b1_2d = b1p.reshape(1, dff_p)
    b2_2d = b2.reshape(1, d_model)

    out_shape = jax.ShapeDtypeStruct((mp, d_model), out_dtype)
    vmem_limit = int(min(max(need_bytes, 32 * 1024 * 1024), budget))
    compiler_params = pltpu.CompilerParams(
        dimension_semantics=("parallel", "arbitrary"),
        vmem_limit_bytes=vmem_limit,
    )
    grid = (m_steps, k_steps)
    scratch = [pltpu.VMEM((tm, d_model), jnp.float32)]

    use_dropout = bool(training) and float(dropout_rate) > 0.0
    in_specs, out_spec = _mk_specs(tm, d_model, dff_tile, k_steps,
                                   with_seed=use_dropout)

    if use_dropout:
        kernel = functools.partial(_ffn_dropout_kernel, rate=float(dropout_rate))
        grid_spec = pltpu.PrefetchScalarGridSpec(
            num_scalar_prefetch=1, grid=grid, in_specs=in_specs,
            out_specs=out_spec, scratch_shapes=scratch)
        out = pl.pallas_call(
            kernel, out_shape=out_shape, grid_spec=grid_spec,
            compiler_params=compiler_params,
        )(jnp.asarray([seed], dtype=jnp.int32), x2, w1c, b1_2d, w2c, b2_2d)
    else:
        grid_spec = pltpu.PrefetchScalarGridSpec(
            num_scalar_prefetch=0, grid=grid, in_specs=in_specs,
            out_specs=out_spec, scratch_shapes=scratch)
        out = pl.pallas_call(
            _ffn_kernel, out_shape=out_shape, grid_spec=grid_spec,
            compiler_params=compiler_params,
        )(x2, w1c, b1_2d, w2c, b2_2d)

    if mp != m:
        out = out[:m]
    return out.reshape(orig_shape)


# ---------------------------------------------------------------------------
# Demo / correctness check
# ---------------------------------------------------------------------------
if __name__ == "__main__":
    def _ref(x, w1, b1, w2, b2):
        hp = jax.lax.Precision.HIGHEST
        h = jnp.dot(x.reshape(-1, x.shape[-1]), w1, precision=hp) + b1
        return (jnp.dot(h, w2, precision=hp) + b2).reshape(
            x.shape[:-1] + (w2.shape[1],))

    BATCH, SEQ = 2, 8

    # Case 1: small shapes (resident weights, k_steps == 1), eval mode.
    D_MODEL, DFF, DROPOUT = 32, 64, 0.1
    kx, kw1, kb1, kw2, kb2 = jax.random.split(jax.random.PRNGKey(0), 5)
    x = jax.random.normal(kx, (BATCH, SEQ, D_MODEL), dtype=jnp.float32)
    # Parameters stored directly as (in, out) (equivalent to torch's W.T).
    w1 = jax.random.normal(kw1, (D_MODEL, DFF), dtype=jnp.float32) * (1.0 / D_MODEL ** 0.5)
    b1 = jax.random.normal(kb1, (DFF,), dtype=jnp.float32) * 0.1
    w2 = jax.random.normal(kw2, (DFF, D_MODEL), dtype=jnp.float32) * (1.0 / DFF ** 0.5)
    b2 = jax.random.normal(kb2, (D_MODEL,), dtype=jnp.float32) * 0.1

    out = jax.block_until_ready(
        feed_forward_block(x, w1, b1, w2, b2, dropout_rate=DROPOUT, training=False))
    ref = _ref(x, w1, b1, w2, b2)
    assert out.shape == (BATCH, SEQ, D_MODEL)
    assert jnp.allclose(out, ref, atol=1e-3, rtol=1e-3), float(
        jnp.max(jnp.abs(out - ref)))

    # Case 2: exercises the dff-tiled accumulating grid axis (k_steps > 1).
    D_MODEL2, DFF2 = 128, 512
    kx, kw1, kb1, kw2, kb2 = jax.random.split(jax.random.PRNGKey(1), 5)
    xb = jax.random.normal(kx, (BATCH, SEQ, D_MODEL2), dtype=jnp.float32)
    w1b = jax.random.normal(kw1, (D_MODEL2, DFF2), dtype=jnp.float32) * (1.0 / D_MODEL2 ** 0.5)
    b1b = jax.random.normal(kb1, (DFF2,), dtype=jnp.float32) * 0.1
    w2b = jax.random.normal(kw2, (DFF2, D_MODEL2), dtype=jnp.float32) * (1.0 / DFF2 ** 0.5)
    b2b = jax.random.normal(kb2, (D_MODEL2,), dtype=jnp.float32) * 0.1

    out2 = jax.block_until_ready(
        feed_forward_block(xb, w1b, b1b, w2b, b2b, dropout_rate=DROPOUT,
                           training=False, max_dff_tile=256))
    ref2 = _ref(xb, w1b, b1b, w2b, b2b)
    assert out2.shape == (BATCH, SEQ, D_MODEL2)
    assert jnp.allclose(out2, ref2, atol=1e-3, rtol=1e-3), float(
        jnp.max(jnp.abs(out2 - ref2)))

    print("KERNEL_OK")
</pallas_src>

<mosaic_0001>
module attributes {stable_mosaic.version = 11 : i64} {
  func.func @_ffn_kernel(%arg0: i32, %arg1: i32, %arg2: memref<8x32xf32, #tpu.memory_space<vmem>>, %arg3: memref<32x64xf32, #tpu.memory_space<vmem>>, %arg4: memref<1x64xf32, #tpu.memory_space<vmem>>, %arg5: memref<64x32xf32, #tpu.memory_space<vmem>>, %arg6: memref<1x32xf32, #tpu.memory_space<vmem>>, %arg7: memref<8x32xf32, #tpu.memory_space<vmem>>, %arg8: memref<8x32xf32, #tpu.memory_space<vmem>>) attributes {dimension_semantics = [#tpu.dimension_semantics<parallel>, #tpu.dimension_semantics<arbitrary>], iteration_bounds = array<i64: 2, 1>, scalar_prefetch = 0 : i64, scratch_operands = 1 : i64, tpu.core_type = #tpu.core_type<tc>, window_params = [{transform_indices = @transform_0, window_bounds = array<i64: 8, 32>}, {pipeline_mode = #tpu.pipeline_mode<synchronous>, transform_indices = @transform_1, window_bounds = array<i64: 32, 64>}, {pipeline_mode = #tpu.pipeline_mode<synchronous>, transform_indices = @transform_2, window_bounds = array<i64: 1, 64>}, {pipeline_mode = #tpu.pipeline_mode<synchronous>, transform_indices = @transform_3, window_bounds = array<i64: 64, 32>}, {pipeline_mode = #tpu.pipeline_mode<synchronous>, transform_indices = @transform_4, window_bounds = array<i64: 1, 32>}, {transform_indices = @transform_5, window_bounds = array<i64: 8, 32>}]} {
    %c0_i32 = arith.constant 0 : i32
    %0 = arith.cmpi eq, %arg1, %c0_i32 : i32
    %1 = arith.extui %0 : i1 to i32
    %c0_i32_0 = arith.constant 0 : i32
    %2 = arith.cmpi ne, %1, %c0_i32_0 : i32
    scf.if %2 {
      %cst_15 = arith.constant 0.000000e+00 : f32
      %17 = vector.broadcast %cst_15 : f32 to vector<8x32xf32>
      %c0_16 = arith.constant 0 : index
      %c0_17 = arith.constant 0 : index
      %18 = vector.load %arg8[%c0_16, %c0_17] : memref<8x32xf32, #tpu.memory_space<vmem>>, vector<8x32xf32>
      tpu.vector_store %arg8[%c0_16, %c0_17], %17 {strides = array<i32>} : memref<8x32xf32, #tpu.memory_space<vmem>>, vector<8x32xf32>,
    } else {
    }
    %c0 = arith.constant 0 : index
    %c0_1 = arith.constant 0 : index
    %3 = vector.load %arg2[%c0, %c0_1] : memref<8x32xf32, #tpu.memory_space<vmem>>, vector<8x32xf32>
    %c0_2 = arith.constant 0 : index
    %c0_3 = arith.constant 0 : index
    %4 = vector.load %arg3[%c0_2, %c0_3] : memref<32x64xf32, #tpu.memory_space<vmem>>, vector<32x64xf32>
    %cst = arith.constant dense<0.000000e+00> : vector<8x64xf32>
    %5 = tpu.matmul %3, %4, %cst {dimension_numbers = #tpu.dot_dimension_numbers<[1], [0], [0], [1], [0, 0, 1, 1], [], []>} : vector<8x32xf32>, vector<32x64xf32>, vector<8x64xf32> -> vector<8x64xf32>
    %c0_4 = arith.constant 0 : index
    %c0_5 = arith.constant 0 : index
    %6 = vector.load %arg4[%c0_4, %c0_5] : memref<1x64xf32, #tpu.memory_space<vmem>>, vector<1x64xf32>
    %7 = vector.broadcast %6 : vector<1x64xf32> to vector<8x64xf32>
    %8 = arith.addf %5, %7 : vector<8x64xf32>
    %c0_6 = arith.constant 0 : index
    %c0_7 = arith.constant 0 : index
    %9 = vector.load %arg8[%c0_6, %c0_7] : memref<8x32xf32, #tpu.memory_space<vmem>>, vector<8x32xf32>
    %c0_8 = arith.constant 0 : index
    %c0_9 = arith.constant 0 : index
    %10 = vector.load %arg5[%c0_8, %c0_9] : memref<64x32xf32, #tpu.memory_space<vmem>>, vector<64x32xf32>
    %cst_10 = arith.constant dense<0.000000e+00> : vector<8x32xf32>
    %11 = tpu.matmul %8, %10, %cst_10 {dimension_numbers = #tpu.dot_dimension_numbers<[1], [0], [0], [1], [0, 0, 1, 1], [], []>} : vector<8x64xf32>, vector<64x32xf32>, vector<8x32xf32> -> vector<8x32xf32>
    %12 = arith.addf %9, %11 : vector<8x32xf32>
    %c0_11 = arith.constant 0 : index
    %c0_12 = arith.constant 0 : index
    %13 = vector.load %arg8[%c0_11, %c0_12] : memref<8x32xf32, #tpu.memory_space<vmem>>, vector<8x32xf32>
    tpu.vector_store %arg8[%c0_11, %c0_12], %12 {strides = array<i32>} : memref<8x32xf32, #tpu.memory_space<vmem>>, vector<8x32xf32>,
    %c0_i32_13 = arith.constant 0 : i32
    %14 = arith.cmpi eq, %arg1, %c0_i32_13 : i32
    %15 = arith.extui %14 : i1 to i32
    %c0_i32_14 = arith.constant 0 : i32
    %16 = arith.cmpi ne, %15, %c0_i32_14 : i32
    scf.if %16 {
      %c0_15 = arith.constant 0 : index
      %c0_16 = arith.constant 0 : index
      %17 = vector.load %arg8[%c0_15, %c0_16] : memref<8x32xf32, #tpu.memory_space<vmem>>, vector<8x32xf32>
      %c0_17 = arith.constant 0 : index
      %c0_18 = arith.constant 0 : index
      %18 = vector.load %arg6[%c0_17, %c0_18] : memref<1x32xf32, #tpu.memory_space<vmem>>, vector<1x32xf32>
      %19 = vector.broadcast %18 : vector<1x32xf32> to vector<8x32xf32>
      %20 = arith.addf %17, %19 : vector<8x32xf32>
      %c0_19 = arith.constant 0 : index
      %c0_20 = arith.constant 0 : index
      %21 = vector.load %arg7[%c0_19, %c0_20] : memref<8x32xf32, #tpu.memory_space<vmem>>, vector<8x32xf32>
      tpu.vector_store %arg7[%c0_19, %c0_20], %20 {strides = array<i32>} : memref<8x32xf32, #tpu.memory_space<vmem>>, vector<8x32xf32>,
    } else {
    }
    return
  }
  func.func @transform_0(%arg0: i32, %arg1: i32) -> (i32, i32) {
    %c0_i32 = arith.constant 0 : i32
    %c0_i32_0 = arith.constant 0 : i32
    return %arg0, %c0_i32 : i32, i32
  }
  func.func @transform_1(%arg0: i32, %arg1: i32) -> (i32, i32) {
    %c0_i32 = arith.constant 0 : i32
    %c0_i32_0 = arith.constant 0 : i32
    return %c0_i32, %arg1 : i32, i32
  }
  func.func @transform_2(%arg0: i32, %arg1: i32) -> (i32, i32) {
    %c0_i32 = arith.constant 0 : i32
    %c0_i32_0 = arith.constant 0 : i32
    return %c0_i32, %arg1 : i32, i32
  }
  func.func @transform_3(%arg0: i32, %arg1: i32) -> (i32, i32) {
    %c0_i32 = arith.constant 0 : i32
    %c0_i32_0 = arith.constant 0 : i32
    return %arg1, %c0_i32 : i32, i32
  }
  func.func @transform_4(%arg0: i32, %arg1: i32) -> (i32, i32) {
    %c0_i32 = arith.constant 0 : i32
    %c0_i32_0 = arith.constant 0 : i32
    %c0_i32_1 = arith.constant 0 : i32
    return %c0_i32, %c0_i32_0 : i32, i32
  }
  func.func @transform_5(%arg0: i32, %arg1: i32) -> (i32, i32) {
    %c0_i32 = arith.constant 0 : i32
    %c0_i32_0 = arith.constant 0 : i32
    return %arg0, %c0_i32 : i32, i32
  }
}

</mosaic_0001>

<bundles_post_ra>
// kernel: tpu_custom_call.1
= control target key start
LH: loop header
LB: loop body
LE: loop exit
PB: predicated region body
PF: predicated region fallthrough
CT: control target
= control target key end

     0   :  { %10 = vsyncpa [#allocation4], 0  ;;  %s1008_s0 = inlined_call_operand.vmem [shape: f32[16,32], index: 0, kind: input, shape index: {}]   ;;  %s1009_s1 = inlined_call_operand.vmem [shape: f32[32,64], index: 1, kind: input, shape index: {}]   ;;  %s1010_s2 = inlined_call_operand.vmem [shape: f32[1,64], index: 2, kind: input, shape index: {}]   ;;  %s1011_s3 = inlined_call_operand.vmem [shape: f32[64,32], index: 3, kind: input, shape index: {}]   ;;  %s1012_s4 = inlined_call_operand.vmem [shape: f32[1,32], index: 4, kind: input, shape index: {}]   ;;  %s1013_s5 = inlined_call_operand.hbm [shape: f32[16,32], index: 5, kind: output, shape index: {}]  }
   0x1   :  { %12 = vsyncpa [#allocation4 + $0x1], 0  ;;  %s850_s18 = smov 0   ;;  %s852_s19 = smov 0  }
   0x2   :  { %s854_s20 = smov 0   ;;  %s856_s21 = smov 0  }
   0x3   :  { %s858_s22 = smov 0   ;;  %s860_s23 = smov 0  }
   0x4 LB: > { %s598_s24 = sadd.s32 4294967295, %s814_s23   ;;  %s599_s25 = sadd.s32 4294967294, %s814_s23   ;;  %s814_s23 = sphi %s860_s23, %s18_s23   ;;  %s810_s22 = sphi %s858_s22, %s1020_s22   ;;  %s806_s21 = sphi %s856_s21, %s1019_s21   ;;  %s802_s20 = sphi %s854_s20, %s1018_s20   ;;  %s798_s19 = sphi %s852_s19, %s1017_s19   ;;  %s794_s18 = sphi %s850_s18, %s1016_s18  }
   0x5   : > { %s30_s26 = sadd.s32 1, %s810_s22  ;;  %s162_s27 = sadd.s32 1, %s802_s20 }
   0x6   : > { %p32_p0 = scmp.ge.s32.totalorder %s30_s26, 2  ;;  %p172_p1 = scmp.ne.s32.totalorder %s802_s20, %s798_s19 }
   0x7   : > { %p173_p2 = scmp.eq.s32.totalorder %s598_s24, 1  ;;  %p178_p3 = scmp.ne.s32.totalorder %s798_s19, %s794_s18 }
   0x8   : > { %s1022_s26 = smov (%p32_p0, %s30_s26), 0  ;;  %p179_p5 = scmp.eq.s32.totalorder %s599_s25, 1 }
   0x9   : > { %p890_p4 = por %p173_p2, %p172_p1  ;;  %s159_s29 = ssub.s32 %s810_s22, %s1022_s26 }
   0xa   : > { %p605_p6 = scmp.ge.s32.totalorder %s814_s23, 1  ;;  %p160_p7 = scmp.eq.s32.totalorder %s159_s29, 0 }
   0xb   : > { %p897_p8 = por %p179_p5, %p178_p3  ;;  %p229_p9 = scmp.lt.s32.totalorder %s814_s23, 3 }
   0xc   : > { %s903_s6 = scalar_select %p160_p7, %s802_s20, %s162_s27  }
   0xd   : > { %p230_p10 = pnand %p605_p6, %p229_p9 }
   0xe   : > { %v292_v0 = vld [vmem:[%s1009_s1] sm:$0xff] (!%p230_p10)  ;;  %v293_v1 = vld [vmem:[%s1009_s1 + $0x8] sm:$0xff] (!%p230_p10)  ;;  %v294_v2 = vld [vmem:[%s1009_s1 + $0x10] sm:$0xff] (!%p230_p10)  ;;  %v816_v3 = vmov (!%p230_p10), 0.0|0.0   ;;  %vm817_vm0 = vmmov (!%p230_p10), 0   ;;  %v818_v6 = vmov (!%p230_p10), 0.0  }
   0xf   : > { %233 = sbr.rel (%p230_p10) target bundleno = 479 (0x1df), region = 40  ;;  %660 = vmatprep.subr.bf16.mxu0 (!%p230_p10), %v816_v3  ;;  %v661_v4 = vpack.c.bf16 (!%p230_p10), %v293_v1, %v292_v0  ;;  %v295_v5 = vld [vmem:[%s1009_s1 + $0x18] sm:$0xff] (!%p230_p10)  ;;  %638 = vmatprep.mubr.msk.f32.mxu0 (!%p230_p10), %vm817_vm0, %v818_v6  ;;  %p268_p11 = scmp.lt.s32.totalorder (!%p230_p10), %s806_s21, 1  ;;  %vm289_vm1 = vcmask (!%p230_p10), 261120   ;;  %v378_v7 = vld [vmem:[%s1011_s3] sm:$0xff] (!%p230_p10)  ;;  %v379_v8 = vld [vmem:[%s1011_s3 + $0x8] sm:$0xff] (!%p230_p10) }
  0x10   : > { %290 = vst.msk [vmem:[#allocation2] sm:$0xff] (!%p230_p10), %vm289_vm1, %v818_v6  ;;  %666 = vmatprep.subr.bf16.mxu1 (!%p230_p10), %v816_v3  ;;  %v667_v9 = vpack.c.bf16 (!%p230_p10), %v379_v8, %v378_v7  ;;  %v380_v10 = vld [vmem:[%s1011_s3 + $0x10] sm:$0xff] (!%p230_p10)  ;;  %v381_v11 = vld [vmem:[%s1011_s3 + $0x18] sm:$0xff] (!%p230_p10)  ;;  %657 = vmatprep.mubr.msk.f32.mxu1 (!%p230_p10), %vm817_vm0, %v818_v6  ;;  %v664_v12 = vpack.c.bf16 (!%p230_p10), %v295_v5, %v294_v2  ;;  %v382_v14 = vld [vmem:[%s1011_s3 + $0x20] sm:$0xff] (!%p230_p10)  ;;  %vm386_vm2 = vcmask (!%p230_p10), 523264   ;;  %s613_s12 = sshll.u32 (!%p230_p10), %s806_s21, 7 }
  0x11   : > { %662 = vmatpush3.bf16.msra.mxu0 (!%p230_p10), %v661_v4  ;;  %v670_v13 = vpack.c.bf16 (!%p230_p10), %v381_v11, %v380_v10  ;;  %v383_v15 = vld [vmem:[%s1011_s3 + $0x28] sm:$0xff] (!%p230_p10)  ;;  %v384_v18 = vld [vmem:[%s1011_s3 + $0x30] sm:$0xff] (!%p230_p10)  ;;  %v385_v19 = vld [vmem:[%s1011_s3 + $0x38] sm:$0xff] (!%p230_p10)  ;;  %s960_s17 = scalar_lea.hbm (!%p230_p10), %s1013_s5, %s613_s12 }
  0x12   : > { %663 = vmatprep.subr.bf16.mxu0 (!%p230_p10), %v816_v3  ;;  %668 = vmatpush3.bf16.msra.mxu1 (!%p230_p10), %v667_v9  ;;  %v673_v17 = vpack.c.bf16 (!%p230_p10), %v383_v15, %v382_v14  ;;  %v676_v20 = vpack.c.bf16 (!%p230_p10), %v385_v19, %v384_v18  ;;  %v608_v21 = vld [vmem:[%s1010_s2] ss:$0 sm:$0xff] (!%p230_p10) }
  0x13   : > { %669 = vmatprep.subr.bf16.mxu1 (!%p230_p10), %v816_v3  ;;  %v611_v29 = vld [vmem:[%s1012_s4] ss:$0 sm:$0xff] (!%p230_p10) }
  0x15   : > { %665 = vmatpush3.bf16.msra.mxu0 (!%p230_p10), %v664_v12 }
  0x16   : > { %s269_s8 = scalar_select %p268_p11, %s806_s21, 1  ;;  %671 = vmatpush3.bf16.msra.mxu1 %v670_v13 }
  0x17   : > { %672 = vmatprep.subr.bf16.mxu1 %v816_v3  ;;  %v377_v25 = vld [vmem:[#allocation2] sm:$0xff]  ;;  %s819_s21 = smov [#allocation3]  }
  0x18   : > { %s607_s9 = sshll.u32 %s269_s8, 3  ;;  %s265_s8 = sand.u32 1, %s798_s19  }
  0x19   : > { %s271_s16 = scalar_lea.vmem %s1008_s0, %s607_s9  ;;  %s606_s9 = sshll.u32 %s265_s8, 3 }
  0x1a   : > { %v291_v16 = vld [vmem:[%s271_s16] sm:$0xff]  ;;  %674 = vmatpush3.bf16.msra.mxu1 %v673_v17  ;;  %s267_s13 = scalar_lea.vmem [#allocation3], %s606_s9  ;;  %s476_s24 = scalar_lea.sflag [#allocation4], %s265_s8 }
  0x1b   : > { %639 = vmatmul.mubr.msk.f32.vlgmr.msra.gmra.mrb[0].mxu0 %vm289_vm1, %v291_v16  ;;  %675 = vmatprep.subr.bf16.mxu1 %v816_v3  ;;  %s489_s14 = sshll.u32 %s267_s13, 4  ;;  %s740_s27 = sshll.u32 %s819_s21, 4  ;;  %s962_s14 = int_to_ptr.vmem [resolvable:$true] %s489_s14  ;;  %s741_s27 = int_to_ptr.vmem [resolvable:$false] %s740_s27 }
  0x1c   : > { %s736_s25 = scalar_lea.vmem %s962_s14, 128  ;;  %s742_s29 = scalar_lea.vmem %s741_s27, 256 }
  0x1d   : > { %p737_p12 = scmp.ne.s32.totalorder %s962_s14, %s736_s25  ;;  %p743_p1 = scmp.lt.s32.totalorder %s962_s14, %s741_s27 }
  0x1e   : > { %677 = vmatpush3.bf16.msra.mxu1 %v676_v20  ;;  %p744_p2 = scmp.lt.s32.totalorder %s742_s29, %s736_s25 }
  0x1f   : > { %p738_p13 = pnand %p737_p12, %p890_p4 }
  0x20   : > { %p745_p3 = por %p744_p2, %p743_p1 }
  0x21   : > { %p739_p0 = pneg %p738_p13 }
  0x23   : > { %p746_p5 = pnand %p745_p3, %p739_p0 }
  0xee   : > { %v373_v22 = vpop.f32.mrb[0].mxu0 }
  0xef   : > { %v374_v23 = vadd.f32 %v608_v21, %v373_v22  ;;  %v640_v24 = vpop.f32.mrb[1].mxu0 }
  0xf1   : > { %658 = vmatmul.mubr.msk.f32.vlgmr.msra.gmra.mrb[0].mxu1 %vm386_vm2, %v374_v23 }
 0x1c4   : > { %v456_v26 = vpop.f32.mrb[0].mxu1 }
 0x1c5   : > { %v460_v27 = vadd.f32 %v456_v26, %v377_v25  ;;  %v659_v28 = vpop.f32.mrb[1].mxu1 }
 0x1c7   : > { %461 = vst.msk [vmem:[#allocation2] sm:$0xff] %vm289_vm1, %v460_v27 }
 0x1ce   : > { %v465_v30 = vld [vmem:[#allocation2] sm:$0xff] }
 0x1cf   : > { %v473_v31 = vadd.f32 %v611_v29, %v465_v30 }
 0x1d1   : > { %474 = vst.msk [vmem:[%s267_s13] sm:$0xff] %vm289_vm1, %v473_v31 }
 0x1d2   : > { %749 = shalt.err (!%p746_p5)
}
 0x1d3   : > { %s750_s7 = scalar_lea.hbm %s960_s17, 128  ;;  %s754_s10 = scalar_lea.hbm %s1013_s5, 256 }
 0x1d4   : > { %p751_p6 = scmp.ne.s32.totalorder %s960_s17, %s750_s7  ;;  %p755_p10 = scmp.lt.u32.totalorder %s960_s17, %s1013_s5 }
 0x1d5   : > { %p756_p11 = scmp.lt.u32.totalorder %s754_s10, %s750_s7  ;;  %p758_p13 = scmp.lt.u32.totalorder %s750_s7, %s960_s17 }
 0x1d6   : > { %p752_p7 = pnand %p751_p6, %p890_p4 }
 0x1d7   : > { %p757_p12 = por %p756_p11, %p755_p10 }
 0x1d8   : > { %p753_p9 = pneg %p752_p7 }
 0x1d9   : > { %p759_p0 = por %p758_p13, %p757_p12 }
 0x1db   : > { %p760_p1 = pnand %p759_p0, %p753_p9 }
 0x1dd   : > { %763 = shalt.err (!%p760_p1)
}
 0x1de   : > { %678 = dma.vmem_to_hbm [thread:$0]  (%p890_p4), %s962_s14, 128, %s960_s17, %s476_s24  }
 0x1df PF: > { %p684_p2 = scmp.ge.s32.totalorder %s814_s23, 2  ;;  %s501_s13 = sand.u32 1, %s794_s18  }
 0x1e0   : > { %s502_s15 = scalar_lea.sflag [#allocation4], %s501_s13 }
 0x1e1   : > { %p681_p3 = pnand %p684_p2, %p897_p8 }
 0x1e3   : > { %789 = dma.done.wait (!%p681_p3), %s502_s15, 128  }
 0x1e4   : > { %791 = vsyncadd (!%p681_p3), %s502_s15, 4294967168  ;;  %s18_s23 = sadd.s32 1, %s814_s23   ;;  %s1016_s18 = smov %s798_s19 }
 0x1e5   : > { %p15_p5 = scmp.ge.s32.totalorder %s18_s23, 4   ;;  %s1017_s19 = smov %s802_s20 }
 0x1e6   : > { %s1018_s20 = smov %s903_s6  ;;  %s1019_s21 = smov %s810_s22 }
 0x1e7   : > { %s1020_s22 = smov %s1022_s26  ;;  %17 = sbr.rel (!%p15_p5) target bundleno = 4 (0x4), region = 92 }
 0x1ee   :  { %507 = vsyncpa [#allocation4], 1 }
 0x1ef   :  { %509 = vsyncpa [#allocation4 + $0x1], 1 }

</bundles_post_ra>
